<compile_context>
chip_gen: v7x
topology: tpu7x:2x2x1
jax: 0.10.0
libtpu: 0.0.40
codegen_flags: <defaults>
</compile_context>

<pallas_src>
import jax
import jax.numpy as jnp
from jax.experimental import pallas as pl
from jax.experimental.pallas import tpu as pltpu

INPUT_DIM = 10
HIDDEN_DIM = 20
OUTPUT_DIM = 5

LANE = 128                      # vreg lane width; packed output slab width
FC1_OFF = 0                     # fc1 occupies lanes [0, 20)
OUT_OFF = HIDDEN_DIM            # fc2 output occupies lanes [20, 25)


def _round_up(n, m):
    return ((n + m - 1) // m) * m


def simplenet_kernel(x_ref, w1_ref, b1_ref, w2_ref, b2_ref, comb_ref):
    # fc1: x @ W1p + b1p -> (TB, 128); real values on lanes [0,20), zeros elsewhere
    # (padded W1 columns and b1 lanes are zero).
    x = x_ref[...]
    x1 = jnp.dot(x, w1_ref[...], preferred_element_type=jnp.float32) + b1_ref[...]

    # ReLU on the f32 accumulator (VPU). Zero lanes stay zero.
    x2 = jnp.maximum(x1, 0.0)

    # fc2: relu(x1) @ W2p + b2p -> (TB, 128); real values on lanes [20,25),
    # zeros elsewhere (W2p columns outside [20,25) and b2p lanes are zero).
    y = jnp.dot(x2, w2_ref[...], preferred_element_type=jnp.float32) + b2_ref[...]

    # Disjoint lane occupancy -> packing is a single VPU add; one unmasked
    # lane-dense 128-wide store per row.
    comb_ref[...] = (x1 + y).astype(comb_ref.dtype)


def simplenet_forward(x, w1, b1, w2, b2, *, block_b=1024):
    """Forward pass. Returns (out, fc1, relu) in f32 with true (unpadded) shapes."""
    B = x.shape[0]

    # Batch tile: multiple of 8 (f32 sublane); avoid over-padding tiny batches.
    tb = min(block_b, _round_up(B, 8))
    bp = _round_up(B, tb)

    # Pad batch rows of x (zeros) so the grid divides evenly.
    x_p = jnp.pad(x.astype(jnp.float32), ((0, bp - B), (0, 0)))

    # One-time lane padding / placement of the tiny weights and biases:
    #   W1p, b1p: real values on output lanes [0,20), zeros on [20,128).
    #   W2p, b2p: real values on output lanes [20,25), zeros elsewhere; K rows
    #             [20,128) are zero so padded hidden lanes contribute nothing.
    w1_p = jnp.zeros((INPUT_DIM, LANE), jnp.float32).at[:, :HIDDEN_DIM].set(
        w1.astype(jnp.float32))
    b1_p = jnp.zeros((1, LANE), jnp.float32).at[:, :HIDDEN_DIM].set(
        b1.astype(jnp.float32))
    w2_p = jnp.zeros((LANE, LANE), jnp.float32).at[
        :HIDDEN_DIM, OUT_OFF:OUT_OFF + OUTPUT_DIM].set(w2.astype(jnp.float32))
    b2_p = jnp.zeros((1, LANE), jnp.float32).at[
        :, OUT_OFF:OUT_OFF + OUTPUT_DIM].set(b2.astype(jnp.float32))

    grid = (bp // tb,)

    comb = pl.pallas_call(
        simplenet_kernel,
        grid=grid,
        in_specs=[
            # x: tiled along batch, auto-pipelined per grid step.
            pl.BlockSpec((tb, INPUT_DIM), lambda i: (i, 0)),
            # Weights/biases: constant index_map -> resident in VMEM.
            pl.BlockSpec((INPUT_DIM, LANE), lambda i: (0, 0)),
            pl.BlockSpec((1, LANE), lambda i: (0, 0)),
            pl.BlockSpec((LANE, LANE), lambda i: (0, 0)),
            pl.BlockSpec((1, LANE), lambda i: (0, 0)),
        ],
        out_specs=pl.BlockSpec((tb, LANE), lambda i: (i, 0)),
        out_shape=jax.ShapeDtypeStruct((bp, LANE), jnp.float32),
        compiler_params=pltpu.CompilerParams(
            dimension_semantics=("parallel",),   # batch axis -> both TCs on v7x
        ),
    )(x_p, w1_p, b1_p, w2_p, b2_p)

    # Slice the packed slab; recompute relu in the wrapper (free VPU op, saves
    # a third output stream's worth of kernel HBM writes).
    fc1 = comb[:B, FC1_OFF:FC1_OFF + HIDDEN_DIM]
    out = comb[:B, OUT_OFF:OUT_OFF + OUTPUT_DIM]
    relu = jnp.maximum(fc1, 0.0)
    # TODO(synk): for a pure-throughput v6e/v7x deployment, cast x/weights to
    # bfloat16 at this boundary (keep f32 accumulation) to halve HBM input bytes.
    return out, fc1, relu


def init_params(key):
    """Deterministic init mimicking nn.Linear's U(-1/sqrt(fan_in), 1/sqrt(fan_in))."""
    k1, k2, k3, k4 = jax.random.split(key, 4)
    lim1 = 1.0 / jnp.sqrt(INPUT_DIM)
    lim2 = 1.0 / jnp.sqrt(HIDDEN_DIM)
    # Stored already transposed relative to PyTorch: (in, out).
    w1 = jax.random.uniform(k1, (INPUT_DIM, HIDDEN_DIM), jnp.float32, -lim1, lim1)
    b1 = jax.random.uniform(k2, (1, HIDDEN_DIM), jnp.float32, -lim1, lim1)
    w2 = jax.random.uniform(k3, (HIDDEN_DIM, OUTPUT_DIM), jnp.float32, -lim2, lim2)
    b2 = jax.random.uniform(k4, (1, OUTPUT_DIM), jnp.float32, -lim2, lim2)
    return w1, b1, w2, b2


if __name__ == "__main__":
    key = jax.random.PRNGKey(0)
    kx, kp = jax.random.split(key)

    batch = 2
    x = jax.random.normal(kx, (batch, INPUT_DIM), jnp.float32)
    w1, b1, w2, b2 = init_params(kp)

    out, fc1, relu = simplenet_forward(x, w1, b1, w2, b2)
    jax.block_until_ready((out, fc1, relu))

    # Pure-JAX reference check of forward semantics.
    fc1_ref = x @ w1 + b1
    relu_ref = jnp.maximum(fc1_ref, 0.0)
    out_ref = relu_ref @ w2 + b2
    assert jnp.allclose(fc1, fc1_ref, atol=1e-5)
    assert jnp.allclose(relu, relu_ref, atol=1e-5)
    assert jnp.allclose(out, out_ref, atol=1e-5)
    assert out.shape == (batch, OUTPUT_DIM)
    assert fc1.shape == (batch, HIDDEN_DIM)
    assert relu.shape == (batch, HIDDEN_DIM)

    # Also exercise a multi-tile batch to cover the grid > 1 path.
    xb = jax.random.normal(kx, (2048 + 17, INPUT_DIM), jnp.float32)
    out_b, fc1_b, relu_b = simplenet_forward(xb, w1, b1, w2, b2)
    jax.block_until_ready((out_b, fc1_b, relu_b))
    fc1_bref = xb @ w1 + b1
    out_bref = jnp.maximum(fc1_bref, 0.0) @ w2 + b2
    assert jnp.allclose(fc1_b, fc1_bref, atol=1e-4)
    assert jnp.allclose(out_b, out_bref, atol=1e-4)

    print("KERNEL_OK")
</pallas_src>

<mosaic_0001>
module attributes {stable_mosaic.version = 11 : i64} {
  func.func @simplenet_kernel(%arg0: i32, %arg1: memref<8x10xf32, #tpu.memory_space<vmem>>, %arg2: memref<10x128xf32, #tpu.memory_space<vmem>>, %arg3: memref<1x128xf32, #tpu.memory_space<vmem>>, %arg4: memref<128x128xf32, #tpu.memory_space<vmem>>, %arg5: memref<1x128xf32, #tpu.memory_space<vmem>>, %arg6: memref<8x128xf32, #tpu.memory_space<vmem>>) attributes {dimension_semantics = [#tpu.dimension_semantics<parallel>], iteration_bounds = array<i64: 1>, scalar_prefetch = 0 : i64, scratch_operands = 0 : i64, tpu.core_type = #tpu.core_type<tc>, window_params = [{transform_indices = @transform_0, window_bounds = array<i64: 8, 10>}, {pipeline_mode = #tpu.pipeline_mode<synchronous>, transform_indices = @transform_1, window_bounds = array<i64: 10, 128>}, {pipeline_mode = #tpu.pipeline_mode<synchronous>, transform_indices = @transform_2, window_bounds = array<i64: 1, 128>}, {pipeline_mode = #tpu.pipeline_mode<synchronous>, transform_indices = @transform_3, window_bounds = array<i64: 128, 128>}, {pipeline_mode = #tpu.pipeline_mode<synchronous>, transform_indices = @transform_4, window_bounds = array<i64: 1, 128>}, {transform_indices = @transform_5, window_bounds = array<i64: 8, 128>}]} {
    %c0 = arith.constant 0 : index
    %c0_0 = arith.constant 0 : index
    %0 = vector.load %arg1[%c0, %c0_0] : memref<8x10xf32, #tpu.memory_space<vmem>>, vector<8x10xf32>
    %c0_1 = arith.constant 0 : index
    %c0_2 = arith.constant 0 : index
    %1 = vector.load %arg2[%c0_1, %c0_2] : memref<10x128xf32, #tpu.memory_space<vmem>>, vector<10x128xf32>
    %cst = arith.constant dense<0.000000e+00> : vector<8x128xf32>
    %2 = tpu.matmul %0, %1, %cst {dimension_numbers = #tpu.dot_dimension_numbers<[1], [0], [0], [1], [0, 0, 1, 1], [], []>} : vector<8x10xf32>, vector<10x128xf32>, vector<8x128xf32> -> vector<8x128xf32>
    %c0_3 = arith.constant 0 : index
    %c0_4 = arith.constant 0 : index
    %3 = vector.load %arg3[%c0_3, %c0_4] : memref<1x128xf32, #tpu.memory_space<vmem>>, vector<1x128xf32>
    %4 = vector.broadcast %3 : vector<1x128xf32> to vector<8x128xf32>
    %5 = arith.addf %2, %4 : vector<8x128xf32>
    %cst_5 = arith.constant 0.000000e+00 : f32
    %6 = vector.broadcast %cst_5 : f32 to vector<8x128xf32>
    %7 = arith.maximumf %5, %6 : vector<8x128xf32>
    %c0_6 = arith.constant 0 : index
    %c0_7 = arith.constant 0 : index
    %8 = vector.load %arg4[%c0_6, %c0_7] : memref<128x128xf32, #tpu.memory_space<vmem>>, vector<128x128xf32>
    %cst_8 = arith.constant dense<0.000000e+00> : vector<8x128xf32>
    %9 = tpu.matmul %7, %8, %cst_8 {dimension_numbers = #tpu.dot_dimension_numbers<[1], [0], [0], [1], [0, 0, 1, 1], [], []>} : vector<8x128xf32>, vector<128x128xf32>, vector<8x128xf32> -> vector<8x128xf32>
    %c0_9 = arith.constant 0 : index
    %c0_10 = arith.constant 0 : index
    %10 = vector.load %arg5[%c0_9, %c0_10] : memref<1x128xf32, #tpu.memory_space<vmem>>, vector<1x128xf32>
    %11 = vector.broadcast %10 : vector<1x128xf32> to vector<8x128xf32>
    %12 = arith.addf %9, %11 : vector<8x128xf32>
    %13 = arith.addf %5, %12 : vector<8x128xf32>
    %c0_11 = arith.constant 0 : index
    %c0_12 = arith.constant 0 : index
    %14 = vector.load %arg6[%c0_11, %c0_12] : memref<8x128xf32, #tpu.memory_space<vmem>>, vector<8x128xf32>
    tpu.vector_store %arg6[%c0_11, %c0_12], %13 {strides = array<i32>} : memref<8x128xf32, #tpu.memory_space<vmem>>, vector<8x128xf32>,
    return
  }
  func.func @transform_0(%arg0: i32) -> (i32, i32) {
    %c0_i32 = arith.constant 0 : i32
    %c0_i32_0 = arith.constant 0 : i32
    return %arg0, %c0_i32 : i32, i32
  }
  func.func @transform_1(%arg0: i32) -> (i32, i32) {
    %c0_i32 = arith.constant 0 : i32
    %c0_i32_0 = arith.constant 0 : i32
    %c0_i32_1 = arith.constant 0 : i32
    return %c0_i32, %c0_i32_0 : i32, i32
  }
  func.func @transform_2(%arg0: i32) -> (i32, i32) {
    %c0_i32 = arith.constant 0 : i32
    %c0_i32_0 = arith.constant 0 : i32
    %c0_i32_1 = arith.constant 0 : i32
    return %c0_i32, %c0_i32_0 : i32, i32
  }
  func.func @transform_3(%arg0: i32) -> (i32, i32) {
    %c0_i32 = arith.constant 0 : i32
    %c0_i32_0 = arith.constant 0 : i32
    %c0_i32_1 = arith.constant 0 : i32
    return %c0_i32, %c0_i32_0 : i32, i32
  }
  func.func @transform_4(%arg0: i32) -> (i32, i32) {
    %c0_i32 = arith.constant 0 : i32
    %c0_i32_0 = arith.constant 0 : i32
    %c0_i32_1 = arith.constant 0 : i32
    return %c0_i32, %c0_i32_0 : i32, i32
  }
  func.func @transform_5(%arg0: i32) -> (i32, i32) {
    %c0_i32 = arith.constant 0 : i32
    %c0_i32_0 = arith.constant 0 : i32
    return %arg0, %c0_i32 : i32, i32
  }
}

</mosaic_0001>

<bundles_post_ra>
// kernel: tpu_custom_call.1
= control target key start
LH: loop header
LB: loop body
LE: loop exit
PB: predicated region body
PF: predicated region fallthrough
CT: control target
= control target key end

     0   :  { %10 = vsyncpa [#allocation3], 0  ;;  %s558_s0 = inlined_call_operand.hbm [shape: f32[8,10], index: 0, kind: input, shape index: {}]   ;;  %s559_s1 = inlined_call_operand.hbm [shape: f32[10,128], index: 1, kind: input, shape index: {}]   ;;  %s560_s2 = inlined_call_operand.vmem [shape: f32[1,128], index: 2, kind: input, shape index: {}]   ;;  %s561_s3 = inlined_call_operand.hbm [shape: f32[128,128], index: 3, kind: input, shape index: {}]   ;;  %s562_s4 = inlined_call_operand.vmem [shape: f32[1,128], index: 4, kind: input, shape index: {}]   ;;  %s563_s5 = inlined_call_operand.hbm [shape: f32[8,128], index: 5, kind: output, shape index: {}]  }
   0x1   :  { %11 = vsyncpa [#allocation6], 0 }
   0x2   :  { %12 = vsyncpa [#allocation4], 0  ;;  %s458_s18 = smov [#allocation5]   ;;  %s364_s22 = scalar_lea.hbm %s559_s1, 256 }
   0x3   :  { %s28_s19 = sshll.u32 %s458_s18, 4  ;;  %p365_p0 = scmp.ne.s32.totalorder %s559_s1, %s364_s22  ;;  %s29_s19 = int_to_ptr.vmem [resolvable:$true] %s28_s19 }
   0x4   :  { %p368_p1 = scmp.lt.u32.totalorder %s364_s22, %s559_s1 }
   0x6   :  { %p370_p2 = pnand %p368_p1, %p365_p0 }
   0x8   :  { %373 = shalt.err (!%p370_p2)
}
   0x9   :  { %s374_s27 = scalar_lea.vmem %s29_s19, 256  ;;  %p379_p4 = scmp.lt.s32.totalorder %s29_s19, %s29_s19 }
   0xa   :  { %p375_p3 = scmp.ne.s32.totalorder %s29_s19, %s374_s27  ;;  %p380_p5 = scmp.lt.s32.totalorder %s374_s27, %s374_s27 }
   0xc   :  { %p381_p6 = por %p380_p5, %p379_p4 }
   0xe   :  { %p382_p7 = pnand %p381_p6, %p375_p3 }
  0x10   :  { %385 = shalt.err (!%p382_p7)
}
  0x11   :  { %s459_s28 = smov 128   ;;  %s460_s29 = smov 8  }
  0x12   :  { %34 = dma.hbm_to_vmem [thread:$0]  %s559_s1, 256, %s29_s19, [#allocation6], %s459_s28, %s459_s28, %s460_s29  }
  0x13   :  { %s461_s7 = smov [#allocation2]   ;;  %s462_s9 = smov [#allocation7]  }
  0x14   :  { %s19_s8 = sshll.u32 %s461_s7, 4  ;;  %s42_s10 = sshll.u32 %s462_s9, 4  ;;  %s20_s8 = int_to_ptr.vmem [resolvable:$true] %s19_s8  ;;  %s43_s10 = int_to_ptr.vmem [resolvable:$true] %s42_s10 }
  0x15   :  { %s386_s13 = scalar_lea.hbm %s558_s0, 128 }
  0x16   :  { %p387_p8 = scmp.ne.s32.totalorder %s558_s0, %s386_s13  ;;  %p390_p9 = scmp.lt.u32.totalorder %s386_s13, %s558_s0 }
  0x18   :  { %p392_p10 = pnand %p390_p9, %p387_p8 }
  0x1a   :  { %395 = shalt.err (!%p392_p10)
}
  0x1b   :  { %s396_s1 = scalar_lea.vmem %s20_s8, 128  ;;  %p401_p12 = scmp.lt.s32.totalorder %s20_s8, %s20_s8 }
  0x1c   :  { %p397_p11 = scmp.ne.s32.totalorder %s20_s8, %s396_s1  ;;  %p402_p13 = scmp.lt.s32.totalorder %s396_s1, %s396_s1 }
  0x1e   :  { %p403_p0 = por %p402_p13, %p401_p12 }
  0x20   :  { %p404_p1 = pnand %p403_p0, %p397_p11 }
  0x22   :  { %407 = shalt.err (!%p404_p1)
}
  0x23   :  { %22 = dma.hbm_to_vmem [thread:$0]  %s558_s0, 128, %s20_s8, [#allocation3]  }
  0x24   :  { %s408_s22 = scalar_lea.hbm %s561_s3, 2048 }
  0x25   :  { %p409_p2 = scmp.ne.s32.totalorder %s561_s3, %s408_s22  ;;  %p412_p3 = scmp.lt.u32.totalorder %s408_s22, %s561_s3 }
  0x27   :  { %p414_p4 = pnand %p412_p3, %p409_p2 }
  0x29   :  { %417 = shalt.err (!%p414_p4)
}
  0x2a   :  { %s418_s27 = scalar_lea.vmem %s43_s10, 2048  ;;  %p423_p6 = scmp.lt.s32.totalorder %s43_s10, %s43_s10 }
  0x2b   :  { %p419_p5 = scmp.ne.s32.totalorder %s43_s10, %s418_s27  ;;  %p424_p7 = scmp.lt.s32.totalorder %s418_s27, %s418_s27 }
  0x2d   :  { %p425_p8 = por %p424_p7, %p423_p6 }
  0x2f   :  { %p426_p9 = pnand %p425_p8, %p419_p5 }
  0x31   :  { %429 = shalt.err (!%p426_p9)
}
  0x32   :  { %48 = dma.hbm_to_vmem [thread:$0]  %s561_s3, 2048, %s43_s10, [#allocation6], %s459_s28, %s459_s28, %s460_s29  }
  0x33   :  { %452 = dma.done.wait [#allocation3], 128  }
  0x34   :  { %453 = vsyncadd [#allocation3], 4294967168 }
  0x35   :  { %454 = dma.done.wait [#allocation6], 2304  }
  0x36   :  { %455 = vsyncadd [#allocation6], 4294964992  ;;  %v463_v0 = vmov 0.0|0.0   ;;  %vm464_vm0 = vmmov 0   ;;  %v465_v1 = vmov 0.0   ;;  %vm74_vm1 = vcmask 1041408  }
  0x37   :  { %326 = vmatprep.subr.bf16.mxu0 %v463_v0  ;;  %330 = vmatprep.subr.bf16.mxu1 %v463_v0  ;;  %v61_v2 = vld [vmem:[#allocation5] sm:$0xff]  ;;  %v62_v3 = vld [vmem:[#allocation5 + $0x8] sm:$0x3]  ;;  %vm466_vm2 = vmmov 1   ;;  %v149_v5 = vld [vmem:[#allocation7] sm:$0xff]  ;;  %vm70_vm4 = vcmask 80896  }
  0x38   :  { %288 = vmatprep.mubr.msk.f32.mxu0 %vm464_vm0, %v465_v1  ;;  %323 = vmatprep.mubr.msk.f32.mxu1 %vm464_vm0, %v465_v1  ;;  %vm328_vm3 = vmpackc.low %vm74_vm1, %vm466_vm2  ;;  %v327_v4 = vpack.c.bf16 %v62_v3, %v61_v2  ;;  %v150_v6 = vld [vmem:[#allocation7 + $0x8] sm:$0xff]  ;;  %v151_v7 = vld [vmem:[#allocation7 + $0x10] sm:$0xff]  ;;  %s467_s7 = smov [#allocation8]  }
  0x39   :  { %v331_v8 = vpack.c.bf16 %v150_v6, %v149_v5  ;;  %v152_v9 = vld [vmem:[#allocation7 + $0x18] sm:$0xff]  ;;  %v60_v10 = vld [vmem:[#allocation2] sm:$0xff]  ;;  %v153_v12 = vld [vmem:[#allocation7 + $0x20] sm:$0xff]  ;;  %s250_s8 = sshll.u32 %s467_s7, 4  ;;  %s251_s8 = int_to_ptr.vmem [resolvable:$true] %s250_s8 }
  0x3a   :  { %329 = vmatpush3.bf16.msk.msra.mxu0 %vm328_vm3, %v327_v4  ;;  %v334_v11 = vpack.c.bf16 %v152_v9, %v151_v7  ;;  %v154_v13 = vld [vmem:[#allocation7 + $0x28] sm:$0xff]  ;;  %v155_v15 = vld [vmem:[#allocation7 + $0x30] sm:$0xff]  ;;  %v156_v16 = vld [vmem:[#allocation7 + $0x38] sm:$0xff]  ;;  %s430_s9 = scalar_lea.vmem %s251_s8, 128  ;;  %p435_p11 = scmp.lt.s32.totalorder %s251_s8, %s251_s8 }
  0x3b   :  { %332 = vmatpush3.bf16.msra.mxu1 %v331_v8  ;;  %v337_v14 = vpack.c.bf16 %v154_v13, %v153_v12  ;;  %v340_v17 = vpack.c.bf16 %v156_v16, %v155_v15  ;;  %v157_v18 = vld [vmem:[#allocation7 + $0x40] sm:$0xff]  ;;  %v158_v19 = vld [vmem:[#allocation7 + $0x48] sm:$0xff]  ;;  %v159_v21 = vld [vmem:[#allocation7 + $0x50] sm:$0xff]  ;;  %p431_p10 = scmp.ne.s32.totalorder %s251_s8, %s430_s9  ;;  %p436_p12 = scmp.lt.s32.totalorder %s430_s9, %s430_s9 }
  0x3c   :  { %333 = vmatprep.subr.bf16.mxu1 %v463_v0  ;;  %v343_v20 = vpack.c.bf16 %v158_v19, %v157_v18  ;;  %v160_v22 = vld [vmem:[#allocation7 + $0x58] sm:$0xff]  ;;  %v161_v24 = vld [vmem:[#allocation7 + $0x60] sm:$0xff]  ;;  %v162_v25 = vld [vmem:[#allocation7 + $0x68] sm:$0xff] }
  0x3d   :  { %289 = vmatmul.mubr.msk.f32.vlgmr.msra.gmra.mrb[0].mxu0 %vm70_vm4, %v60_v10  ;;  %v346_v23 = vpack.c.bf16 %v160_v22, %v159_v21  ;;  %v349_v26 = vpack.c.bf16 %v162_v25, %v161_v24  ;;  %v163_v27 = vld [vmem:[#allocation7 + $0x70] sm:$0xff]  ;;  %v164_v28 = vld [vmem:[#allocation7 + $0x78] sm:$0xff]  ;;  %v260_v30 = vld [vmem:[%s560_s2] ss:$0 sm:$0xff]  ;;  %p437_p13 = por %p436_p12, %p435_p11 }
  0x3e   :  { %v352_v29 = vpack.c.bf16 %v164_v28, %v163_v27  ;;  %v263_v35 = vld [vmem:[%s562_s4] ss:$0 sm:$0xff] }
  0x3f   :  { %335 = vmatpush3.bf16.msra.mxu1 %v334_v11  ;;  %p438_p0 = pnand %p437_p13, %p431_p10 }
  0x40   :  { %336 = vmatprep.subr.bf16.mxu1 %v463_v0 }
  0x43   :  { %338 = vmatpush3.bf16.msra.mxu1 %v337_v14 }
  0x44   :  { %339 = vmatprep.subr.bf16.mxu1 %v463_v0 }
  0x47   :  { %341 = vmatpush3.bf16.msra.mxu1 %v340_v17 }
  0x48   :  { %342 = vmatprep.subr.bf16.mxu1 %v463_v0 }
  0x4b   :  { %344 = vmatpush3.bf16.msra.mxu1 %v343_v20 }
  0x4c   :  { %345 = vmatprep.subr.bf16.mxu1 %v463_v0 }
  0x4f   :  { %347 = vmatpush3.bf16.msra.mxu1 %v346_v23 }
  0x50   :  { %348 = vmatprep.subr.bf16.mxu1 %v463_v0 }
  0x53   :  { %350 = vmatpush3.bf16.msra.mxu1 %v349_v26 }
  0x54   :  { %351 = vmatprep.subr.bf16.mxu1 %v463_v0 }
  0x57   :  { %353 = vmatpush3.bf16.msra.mxu1 %v352_v29 }
 0x110   :  { %v144_v31 = vpop.f32.mrb[0].mxu0 }
 0x111   :  { %v145_v32 = vadd.f32 %v260_v30, %v144_v31  ;;  %v290_v33 = vpop.f32.mrb[1].mxu0 }
 0x113   :  { %v148_v34 = vmax.f32 %v145_v32, 0.0 }
 0x115   :  { %324 = vmatmul.mubr.f32.vlgmr.msra.gmra.mrb[0].mxu1 %v148_v34 }
 0x1e8   :  { %v238_v36 = vpop.f32.mrb[0].mxu1 }
 0x1e9   :  { %v239_v37 = vadd.f32 %v263_v35, %v238_v36  ;;  %v325_v38 = vpop.f32.mrb[1].mxu1 }
 0x1eb   :  { %v242_v39 = vadd.f32 %v239_v37, %v145_v32 }
 0x1ed   :  { %243 = vst [vmem:[#allocation8] sm:$0xff] %v242_v39 }
 0x1ee   :  { %441 = shalt.err (!%p438_p0)
}
 0x1ef   :  { %s442_s11 = scalar_lea.hbm %s563_s5, 128 }
 0x1f0   :  { %p443_p1 = scmp.ne.s32.totalorder %s563_s5, %s442_s11  ;;  %p446_p2 = scmp.lt.u32.totalorder %s442_s11, %s563_s5 }
 0x1f2   :  { %p448_p3 = pnand %p446_p2, %p443_p1 }
 0x1f4   :  { %451 = shalt.err (!%p448_p3)
}
 0x1f5   :  { %253 = dma.vmem_to_hbm [thread:$0]  %s251_s8, 128, %s563_s5, [#allocation4]  }
 0x1f6   :  { %456 = dma.done.wait [#allocation4], 128  }
 0x1f7   :  { %457 = vsyncadd [#allocation4], 4294967168 }
 0x1f8   :  { %257 = vsyncpa [#allocation3], 1 }
 0x1f9   :  { %258 = vsyncpa [#allocation6], 1 }
 0x1fa   :  { %259 = vsyncpa [#allocation4], 1 }

</bundles_post_ra>
